<compile_context>
chip_gen: v7x
topology: tpu7x:2x2x1
jax: 0.10.0
libtpu: 0.0.40
codegen_flags: <defaults>
</compile_context>

<pallas_src>
import math

import jax
import jax.numpy as jnp
from jax.experimental import pallas as pl
from jax.experimental.pallas import tpu as pltpu


def _spatial_attention_kernel(x_ref, aop_ref, mop_ref, o_ref):
    x = x_ref[...]                                           # (bt, C, L) native dtype
    c = x_ref.shape[1]

    # Channel squeeze: mean (f32 accumulation, scale the small map) and max.
    avg = jnp.sum(x, axis=1, dtype=jnp.float32) * jnp.float32(1.0 / c)  # (bt, L)
    mx = jnp.max(x, axis=1).astype(jnp.float32)                          # (bt, L)

    # Conv1d(2 -> 1, K taps, 'same' zero padding, no bias) as banded-Toeplitz
    # matmuls on the MXU: y[l] = sum_j avg[j]*A_avg[j,l] + mx[j]*A_max[j,l].
    y = (jnp.dot(avg, aop_ref[...], preferred_element_type=jnp.float32,
                 precision=jax.lax.Precision.HIGHEST)
         + jnp.dot(mx, mop_ref[...], preferred_element_type=jnp.float32,
                   precision=jax.lax.Precision.HIGHEST))                 # (bt, L)

    attn = jax.nn.sigmoid(y).astype(x.dtype)                             # (bt, L)
    o_ref[...] = x * attn[:, None, :]                                    # (bt, C, L)


def _toeplitz_operators(conv_w, L):
    """PyTorch Conv1d weight (1, 2, K) -> two (L, L) banded operators.

    out[l] = sum_j in[j] * A[j, l] with A[j, l] = w[j - l + pad]
    for 0 <= j - l + pad < K, else 0  (cross-correlation, zero 'same' pad).
    """
    w = conv_w.reshape(2, -1).astype(jnp.float32)
    K = w.shape[-1]
    pad = (K - 1) // 2
    j = jnp.arange(L)[:, None]          # input position (rows)
    l = jnp.arange(L)[None, :]          # output position (cols)
    tap = j - l + pad
    valid = (tap >= 0) & (tap < K)
    tap = jnp.clip(tap, 0, K - 1)
    a_op = jnp.where(valid, w[0][tap], 0.0)   # operator for the avg channel
    m_op = jnp.where(valid, w[1][tap], 0.0)   # operator for the max channel
    return a_op, m_op


def spatial_attention(x, conv_w, *, block_bytes=2 << 20):
    """x: (B, C, L); conv_w: (1, 2, K) PyTorch Conv1d weight (no bias)."""
    B, C, L = x.shape
    a_op, m_op = _toeplitz_operators(conv_w, L)

    # Batch tile sized so double-buffered input+output slabs stay well within
    # the default scoped VMEM on all TPU generations.
    per_batch = C * L * x.dtype.itemsize
    b_tile = int(max(1, min(B, block_bytes // max(per_batch, 1))))
    grid = (pl.cdiv(B, b_tile),)

    return pl.pallas_call(
        _spatial_attention_kernel,
        out_shape=jax.ShapeDtypeStruct((B, C, L), x.dtype),
        grid=grid,
        in_specs=[
            pl.BlockSpec((b_tile, C, L), lambda i: (i, 0, 0)),
            pl.BlockSpec((L, L), lambda i: (0, 0)),   # conv operator, resident
            pl.BlockSpec((L, L), lambda i: (0, 0)),   # conv operator, resident
        ],
        out_specs=pl.BlockSpec((b_tile, C, L), lambda i: (i, 0, 0)),
        compiler_params=pltpu.CompilerParams(
            dimension_semantics=("parallel",)),
    )(x, a_op, m_op)


def spatial_attention_ref(x, conv_w):
    """Plain-JAX reference (explicit cross-correlation, zero 'same' padding)."""
    B, C, L = x.shape
    K = conv_w.shape[-1]
    pad = (K - 1) // 2
    avg = jnp.mean(x.astype(jnp.float32), axis=1)             # (B, L)
    mx = jnp.max(x, axis=1).astype(jnp.float32)               # (B, L)
    avg_p = jnp.pad(avg, ((0, 0), (pad, pad)))
    mx_p = jnp.pad(mx, ((0, 0), (pad, pad)))
    y = jnp.zeros((B, L), jnp.float32)
    for k in range(K):
        y = (y + conv_w[0, 0, k] * avg_p[:, k:k + L]
               + conv_w[0, 1, k] * mx_p[:, k:k + L])
    attn = jax.nn.sigmoid(y).astype(x.dtype)
    return x * attn[:, None, :]


if __name__ == "__main__":
    # Small shapes consistent with the module: (batch, channels, length).
    # L is a multiple of 128 so output stores are lane-dense.
    B, C, L, K = 2, 4, 128, 7

    key = jax.random.PRNGKey(0)
    kx, kw = jax.random.split(key)
    x = jax.random.normal(kx, (B, C, L), dtype=jnp.float32)

    # PyTorch Conv1d default init: U(-1/sqrt(fan_in), 1/sqrt(fan_in)), fan_in = 2*K.
    bound = 1.0 / math.sqrt(2 * K)
    conv_w = jax.random.uniform(kw, (1, 2, K), jnp.float32, -bound, bound)

    out = spatial_attention(x, conv_w)
    jax.block_until_ready(out)

    ref = spatial_attention_ref(x, conv_w)
    assert out.shape == (B, C, L) and out.dtype == x.dtype
    assert jnp.allclose(out, ref, atol=1e-4, rtol=1e-4), "mismatch vs reference"

    print("KERNEL_OK")
</pallas_src>

<mosaic_0001>
module attributes {stable_mosaic.version = 11 : i64} {
  func.func @_spatial_attention_kernel(%arg0: i32, %arg1: memref<2x4x128xf32, #tpu.memory_space<vmem>>, %arg2: memref<128x128xf32, #tpu.memory_space<vmem>>, %arg3: memref<128x128xf32, #tpu.memory_space<vmem>>, %arg4: memref<2x4x128xf32, #tpu.memory_space<vmem>>) attributes {dimension_semantics = [#tpu.dimension_semantics<parallel>], iteration_bounds = array<i64: 1>, scalar_prefetch = 0 : i64, scratch_operands = 0 : i64, tpu.core_type = #tpu.core_type<tc>, window_params = [{transform_indices = @transform_0, window_bounds = array<i64: 2, 4, 128>}, {pipeline_mode = #tpu.pipeline_mode<synchronous>, transform_indices = @transform_1, window_bounds = array<i64: 128, 128>}, {pipeline_mode = #tpu.pipeline_mode<synchronous>, transform_indices = @transform_2, window_bounds = array<i64: 128, 128>}, {transform_indices = @transform_3, window_bounds = array<i64: 2, 4, 128>}]} {
    %c0 = arith.constant 0 : index
    %c0_0 = arith.constant 0 : index
    %c0_1 = arith.constant 0 : index
    %0 = vector.load %arg1[%c0, %c0_0, %c0_1] : memref<2x4x128xf32, #tpu.memory_space<vmem>>, vector<2x4x128xf32>
    %cst = arith.constant dense<0.000000e+00> : vector<2x128xf32>
    %1 = vector.multi_reduction <add>, %0, %cst [1] : vector<2x4x128xf32> to vector<2x128xf32>
    %cst_2 = arith.constant 2.500000e-01 : f32
    %2 = vector.broadcast %cst_2 : f32 to vector<2x128xf32>
    %3 = arith.mulf %1, %2 : vector<2x128xf32>
    %cst_3 = arith.constant dense<0xFF800000> : vector<2x128xf32>
    %4 = vector.multi_reduction <maximumf>, %0, %cst_3 [1] : vector<2x4x128xf32> to vector<2x128xf32>
    %c0_4 = arith.constant 0 : index
    %c0_5 = arith.constant 0 : index
    %5 = vector.load %arg2[%c0_4, %c0_5] : memref<128x128xf32, #tpu.memory_space<vmem>>, vector<128x128xf32>
    %cst_6 = arith.constant dense<0.000000e+00> : vector<2x128xf32>
    %6 = tpu.matmul %3, %5, %cst_6 {dimension_numbers = #tpu.dot_dimension_numbers<[1], [0], [0], [1], [0, 0, 1, 1], [], []>, precision = #tpu.contract_precision<fp32>} : vector<2x128xf32>, vector<128x128xf32>, vector<2x128xf32> -> vector<2x128xf32>
    %c0_7 = arith.constant 0 : index
    %c0_8 = arith.constant 0 : index
    %7 = vector.load %arg3[%c0_7, %c0_8] : memref<128x128xf32, #tpu.memory_space<vmem>>, vector<128x128xf32>
    %cst_9 = arith.constant dense<0.000000e+00> : vector<2x128xf32>
    %8 = tpu.matmul %4, %7, %cst_9 {dimension_numbers = #tpu.dot_dimension_numbers<[1], [0], [0], [1], [0, 0, 1, 1], [], []>, precision = #tpu.contract_precision<fp32>} : vector<2x128xf32>, vector<128x128xf32>, vector<2x128xf32> -> vector<2x128xf32>
    %9 = arith.addf %6, %8 : vector<2x128xf32>
    %10 = arith.negf %9 : vector<2x128xf32>
    %11 = math.exp %10 : vector<2x128xf32>
    %cst_10 = arith.constant 1.000000e+00 : f32
    %12 = vector.broadcast %cst_10 : f32 to vector<2x128xf32>
    %13 = arith.addf %12, %11 : vector<2x128xf32>
    %14 = arith.divf %12, %13 : vector<2x128xf32>
    %15 = vector.shape_cast %14 : vector<2x128xf32> to vector<2x1x128xf32>
    %16 = vector.broadcast %15 : vector<2x1x128xf32> to vector<2x4x128xf32>
    %17 = arith.mulf %0, %16 : vector<2x4x128xf32>
    %c0_11 = arith.constant 0 : index
    %c0_12 = arith.constant 0 : index
    %c0_13 = arith.constant 0 : index
    %18 = vector.load %arg4[%c0_11, %c0_12, %c0_13] : memref<2x4x128xf32, #tpu.memory_space<vmem>>, vector<2x4x128xf32>
    tpu.vector_store %arg4[%c0_11, %c0_12, %c0_13], %17 {strides = array<i32>} : memref<2x4x128xf32, #tpu.memory_space<vmem>>, vector<2x4x128xf32>,
    return
  }
  func.func @transform_0(%arg0: i32) -> (i32, i32, i32) {
    %c0_i32 = arith.constant 0 : i32
    %c0_i32_0 = arith.constant 0 : i32
    %c0_i32_1 = arith.constant 0 : i32
    return %arg0, %c0_i32, %c0_i32_0 : i32, i32, i32
  }
  func.func @transform_1(%arg0: i32) -> (i32, i32) {
    %c0_i32 = arith.constant 0 : i32
    %c0_i32_0 = arith.constant 0 : i32
    %c0_i32_1 = arith.constant 0 : i32
    return %c0_i32, %c0_i32_0 : i32, i32
  }
  func.func @transform_2(%arg0: i32) -> (i32, i32) {
    %c0_i32 = arith.constant 0 : i32
    %c0_i32_0 = arith.constant 0 : i32
    %c0_i32_1 = arith.constant 0 : i32
    return %c0_i32, %c0_i32_0 : i32, i32
  }
  func.func @transform_3(%arg0: i32) -> (i32, i32, i32) {
    %c0_i32 = arith.constant 0 : i32
    %c0_i32_0 = arith.constant 0 : i32
    %c0_i32_1 = arith.constant 0 : i32
    return %arg0, %c0_i32, %c0_i32_0 : i32, i32, i32
  }
}

</mosaic_0001>

<bundles_post_ra>
// kernel: tpu_custom_call.1
= control target key start
LH: loop header
LB: loop body
LE: loop exit
PB: predicated region body
PF: predicated region fallthrough
CT: control target
= control target key end

     0   :  { %8 = vsyncpa [#allocation3], 0  ;;  %s3203_s0 = inlined_call_operand.hbm [shape: f32[2,4,128], index: 0, kind: input, shape index: {}]   ;;  %s3204_s1 = inlined_call_operand.hbm [shape: f32[128,128], index: 1, kind: input, shape index: {}]   ;;  %s3205_s2 = inlined_call_operand.hbm [shape: f32[128,128], index: 2, kind: input, shape index: {}]   ;;  %s3206_s3 = inlined_call_operand.hbm [shape: f32[2,4,128], index: 3, kind: output, shape index: {}]  }
   0x1   :  { %9 = vsyncpa [#allocation6], 0 }
   0x2   :  { %10 = vsyncpa [#allocation4], 0  ;;  %s2517_s12 = smov [#allocation5]   ;;  %s2423_s16 = scalar_lea.hbm %s3204_s1, 2048 }
   0x3   :  { %s28_s13 = sshll.u32 %s2517_s12, 4  ;;  %p2424_p0 = scmp.ne.s32.totalorder %s3204_s1, %s2423_s16  ;;  %s29_s13 = int_to_ptr.vmem [resolvable:$true] %s28_s13 }
   0x4   :  { %p2427_p1 = scmp.lt.u32.totalorder %s2423_s16, %s3204_s1 }
   0x6   :  { %p2429_p2 = pnand %p2427_p1, %p2424_p0 }
   0x8   :  { %2432 = shalt.err (!%p2429_p2)
}
   0x9   :  { %s2433_s21 = scalar_lea.vmem %s29_s13, 2048  ;;  %p2438_p4 = scmp.lt.s32.totalorder %s29_s13, %s29_s13 }
   0xa   :  { %p2434_p3 = scmp.ne.s32.totalorder %s29_s13, %s2433_s21  ;;  %p2439_p5 = scmp.lt.s32.totalorder %s2433_s21, %s2433_s21 }
   0xc   :  { %p2440_p6 = por %p2439_p5, %p2438_p4 }
   0xe   :  { %p2441_p7 = pnand %p2440_p6, %p2434_p3 }
  0x10   :  { %2444 = shalt.err (!%p2441_p7)
}
  0x11   :  { %s2518_s22 = smov 128   ;;  %s2519_s23 = smov 8  }
  0x12   :  { %34 = dma.hbm_to_vmem [thread:$0]  %s3204_s1, 2048, %s29_s13, [#allocation6], %s2518_s22, %s2518_s22, %s2519_s23  }
  0x13   :  { %s2520_s26 = smov [#allocation2]   ;;  %s2445_s30 = scalar_lea.hbm %s3203_s0, 128 }
  0x14   :  { %s16_s27 = sshll.u32 %s2520_s26, 4  ;;  %p2446_p8 = scmp.ne.s32.totalorder %s3203_s0, %s2445_s30  ;;  %s17_s27 = int_to_ptr.vmem [resolvable:$true] %s16_s27 }
  0x15   :  { %p2449_p9 = scmp.lt.u32.totalorder %s2445_s30, %s3203_s0 }
  0x17   :  { %p2451_p10 = pnand %p2449_p9, %p2446_p8 }
  0x19   :  { %2454 = shalt.err (!%p2451_p10)
}
  0x1a   :  { %s2455_s8 = scalar_lea.vmem %s17_s27, 128  ;;  %p2460_p12 = scmp.lt.s32.totalorder %s17_s27, %s17_s27 }
  0x1b   :  { %p2456_p11 = scmp.ne.s32.totalorder %s17_s27, %s2455_s8  ;;  %p2461_p13 = scmp.lt.s32.totalorder %s2455_s8, %s2455_s8 }
  0x1d   :  { %p2462_p0 = por %p2461_p13, %p2460_p12 }
  0x1f   :  { %p2463_p1 = pnand %p2462_p0, %p2456_p11 }
  0x21   :  { %2466 = shalt.err (!%p2463_p1)
}
  0x22   :  { %s2521_s1 = smov 64   ;;  %s2522_s9 = smov 4  }
  0x23   :  { %22 = dma.hbm_to_vmem [thread:$0]  %s3203_s0, 128, %s17_s27, [#allocation3], %s2521_s1, %s2521_s1, %s2522_s9  }
  0x24   :  { %s2523_s12 = smov [#allocation7]   ;;  %s2467_s16 = scalar_lea.hbm %s3205_s2, 2048 }
  0x25   :  { %s40_s13 = sshll.u32 %s2523_s12, 4  ;;  %p2468_p2 = scmp.ne.s32.totalorder %s3205_s2, %s2467_s16  ;;  %s41_s13 = int_to_ptr.vmem [resolvable:$true] %s40_s13 }
  0x26   :  { %p2471_p3 = scmp.lt.u32.totalorder %s2467_s16, %s3205_s2 }
  0x28   :  { %p2473_p4 = pnand %p2471_p3, %p2468_p2 }
  0x2a   :  { %2476 = shalt.err (!%p2473_p4)
}
  0x2b   :  { %s2477_s21 = scalar_lea.vmem %s41_s13, 2048  ;;  %p2482_p6 = scmp.lt.s32.totalorder %s41_s13, %s41_s13 }
  0x2c   :  { %p2478_p5 = scmp.ne.s32.totalorder %s41_s13, %s2477_s21  ;;  %p2483_p7 = scmp.lt.s32.totalorder %s2477_s21, %s2477_s21 }
  0x2e   :  { %p2484_p8 = por %p2483_p7, %p2482_p6 }
  0x30   :  { %p2485_p9 = pnand %p2484_p8, %p2478_p5 }
  0x32   :  { %2488 = shalt.err (!%p2485_p9)
}
  0x33   :  { %46 = dma.hbm_to_vmem [thread:$0]  %s3205_s2, 2048, %s41_s13, [#allocation6], %s2518_s22, %s2518_s22, %s2519_s23  }
  0x34   :  { %2511 = dma.done.wait [#allocation3], 128  }
  0x35   :  { %2512 = vsyncadd [#allocation3], 4294967168 }
  0x36   :  { %2513 = dma.done.wait [#allocation6], 4096  }
  0x37   :  { %2514 = vsyncadd [#allocation6], 4294963200  ;;  %v3209_v0 = vmov 0.0|0.0   ;;  %vm2525_vm0 = vmmov 0   ;;  %v3207_v1 = vmov 0.0   ;;  %v105_v2 = vld [vmem:[#allocation7] sm:$0xff] }
  0x38   :  { %2098 = vmatprep.subr.bf16.mxu1 %v3209_v0  ;;  %2242 = vmatprep.subr.bf16.mxu0 %v3209_v0  ;;  %v106_v3 = vld [vmem:[#allocation7 + $0x8] sm:$0xff]  ;;  %v89_v4 = vld [vmem:[#allocation5] sm:$0xff]  ;;  %v127_v5 = vand.u32 4294901760, %v105_v2  ;;  %v107_v9 = vld [vmem:[#allocation7 + $0x10] sm:$0xff]  ;;  %vm58_vm1 = vcmask 1043456   ;;  %vm123_vm2 = vcmask 1041409  }
  0x39   :  { %1710 = vmatprep.mubr.msk.f32.mxu1 %vm2525_vm0, %v3207_v1  ;;  %1920 = vmatprep.mubr.msk.f32.mxu0 %vm2525_vm0, %v3207_v1  ;;  %v130_v6 = vand.u32 4294901760, %v106_v3  ;;  %v90_v7 = vld [vmem:[#allocation5 + $0x8] sm:$0xff]  ;;  %v772_v8 = vand.u32 4294901760, %v89_v4  ;;  %v108_v10 = vld [vmem:[#allocation7 + $0x18] sm:$0xff]  ;;  %v133_v12 = vand.u32 4294901760, %v107_v9  ;;  %v91_v14 = vld [vmem:[#allocation5 + $0x10] sm:$0xff] }
  0x3a   :  { %v775_v11 = vand.u32 4294901760, %v90_v7  ;;  %v136_v13 = vand.u32 4294901760, %v108_v10  ;;  %v92_v15 = vld [vmem:[#allocation5 + $0x18] sm:$0xff]  ;;  %v109_v16 = vld [vmem:[#allocation7 + $0x20] sm:$0xff]  ;;  %v110_v18 = vld [vmem:[#allocation7 + $0x28] sm:$0xff]  ;;  %v778_v23 = vand.u32 4294901760, %v91_v14  ;;  %v2619_v42 = vsub.f32 %v105_v2, %v127_v5 }
  0x3b   :  { %v2600_v17 = vpack.c.bf16 %v130_v6, %v127_v5  ;;  %v93_v19 = vld [vmem:[#allocation5 + $0x20] sm:$0xff]  ;;  %v94_v20 = vld [vmem:[#allocation5 + $0x28] sm:$0xff]  ;;  %v781_v24 = vand.u32 4294901760, %v92_v15  ;;  %v139_v25 = vand.u32 4294901760, %v109_v16  ;;  %v142_v26 = vand.u32 4294901760, %v110_v18  ;;  %v111_v29 = vld [vmem:[#allocation7 + $0x30] sm:$0xff] }
  0x3c   :  { %v2602_v21 = vpack.c.bf16 %v775_v11, %v772_v8  ;;  %v2605_v22 = vpack.c.bf16 %v136_v13, %v133_v12  ;;  %v784_v27 = vand.u32 4294901760, %v93_v19  ;;  %v787_v28 = vand.u32 4294901760, %v94_v20  ;;  %v112_v30 = vld [vmem:[#allocation7 + $0x38] sm:$0xff]  ;;  %v95_v32 = vld [vmem:[#allocation5 + $0x30] sm:$0xff]  ;;  %v113_v40 = vld [vmem:[#allocation7 + $0x40] sm:$0xff]  ;;  %s2528_s2 = smov [#allocation8]  }
  0x3d   :  { %3264 = vst [vmem:[#allocation12_spill] sm:$0xff] %v2600_v17  ;;  %2100 = vmatpush3.bf16.msra.mxu1 %v2600_v17  ;;  %v2610_v31 = vpack.c.bf16 %v781_v24, %v778_v23  ;;  %v96_v33 = vld [vmem:[#allocation5 + $0x38] sm:$0xff]  ;;  %v2613_v34 = vpack.c.bf16 %v142_v26, %v139_v25  ;;  %v145_v35 = vand.u32 4294901760, %v111_v29  ;;  %v148_v36 = vand.u32 4294901760, %v112_v30  ;;  %v114_v41 = vld [vmem:[#allocation7 + $0x48] sm:$0xff]  ;;  %v97_v46 = vld [vmem:[#allocation5 + $0x40] sm:$0xff] }
  0x3e   :  { %3265 = vst [vmem:[#allocation13_spill] sm:$0xff] %v2602_v21  ;;  %3266 = vst [vmem:[#allocation14_spill] sm:$0xff] %v2605_v22  ;;  %2244 = vmatpush3.bf16.msra.mxu0 %v2602_v21  ;;  %2101 = vmatprep.subr.bf16.mxu1 %v3209_v0  ;;  %v2617_v37 = vpack.c.bf16 %v787_v28, %v784_v27  ;;  %v790_v38 = vand.u32 4294901760, %v95_v32  ;;  %v793_v39 = vand.u32 4294901760, %v96_v33  ;;  %v98_v47 = vld [vmem:[#allocation5 + $0x48] sm:$0xff]  ;;  %v151_v54 = vand.u32 4294901760, %v113_v40 }
  0x3f   :  { %2245 = vmatprep.subr.bf16.mxu0 %v3209_v0  ;;  %3267 = vst [vmem:[#allocation15_spill] sm:$0xff] %v2610_v31  ;;  %3268 = vst [vmem:[#allocation16_spill] sm:$0xff] %v2613_v34  ;;  %v2621_v43 = vsub.f32 %v106_v3, %v130_v6  ;;  %v2623_v44 = vsub.f32 %v89_v4, %v772_v8  ;;  %v2625_v45 = vsub.f32 %v90_v7, %v775_v11  ;;  %v115_v56 = vld [vmem:[#allocation7 + $0x50] sm:$0xff]  ;;  %v116_v57 = vld [vmem:[#allocation7 + $0x58] sm:$0xff]  ;;  %s1460_s22 = sshll.u32 %s2528_s2, 4  ;;  %s1461_s22 = int_to_ptr.vmem [resolvable:$true] %s1460_s22 }
  0x40   :  { %3269 = vst [vmem:[#allocation17_spill] sm:$0xff] %v2617_v37  ;;  %v2628_v48 = vsub.f32 %v107_v9, %v133_v12  ;;  %v2630_v49 = vsub.f32 %v108_v10, %v136_v13  ;;  %v2632_v50 = vsub.f32 %v91_v14, %v778_v23  ;;  %v2634_v51 = vsub.f32 %v92_v15, %v781_v24  ;;  %v99_v62 = vld [vmem:[#allocation5 + $0x50] sm:$0xff]  ;;  %v100_v63 = vld [vmem:[#allocation5 + $0x58] sm:$0xff]  ;;  %v117_v6 = vld [vmem:[#allocation7 + $0x60] sm:$0xff]  ;;  %s2489_s23 = scalar_lea.vmem %s1461_s22, 128  ;;  %p2494_p11 = scmp.lt.s32.totalorder %s1461_s22, %s1461_s22 }
  0x41   :  { %2103 = vmatpush3.bf16.msra.mxu1 %v2605_v22  ;;  %v2637_v52 = vsub.f32 %v109_v16, %v139_v25  ;;  %v2639_v53 = vpack.c.bf16 %v148_v36, %v145_v35  ;;  %v154_v55 = vand.u32 4294901760, %v114_v41  ;;  %v2641_v58 = vsub.f32 %v110_v18, %v142_v26  ;;  %v2656_v7 = vld [vmem:[#allocation7 + $0x68] sm:$0xff]  ;;  %v101_v12 = vld [vmem:[#allocation5 + $0x60] sm:$0xff]  ;;  %p2490_p10 = scmp.ne.s32.totalorder %s1461_s22, %s2489_s23  ;;  %p2495_p12 = scmp.lt.s32.totalorder %s2489_s23, %s2489_s23 }
  0x42   :  { %2247 = vmatpush3.bf16.msra.mxu0 %v2610_v31  ;;  %2104 = vmatprep.subr.bf16.mxu1 %v3209_v0  ;;  %v2645_v59 = vpack.c.bf16 %v793_v39, %v790_v38  ;;  %v796_v60 = vand.u32 4294901760, %v97_v46  ;;  %v799_v61 = vand.u32 4294901760, %v98_v47  ;;  %v2647_v2 = vsub.f32 %v93_v19, %v784_v27  ;;  %v102_v13 = vld [vmem:[#allocation5 + $0x68] sm:$0xff] }
  0x43   :  { %2248 = vmatprep.subr.bf16.mxu0 %v3209_v0  ;;  %3270 = vst [vmem:[#allocation18_spill] sm:$0xff] %v2639_v53  ;;  %v2649_v3 = vsub.f32 %v94_v20, %v787_v28  ;;  %v2652_v4 = vsub.f32 %v111_v29, %v145_v35  ;;  %v2654_v5 = vsub.f32 %v112_v30, %v148_v36  ;;  %v157_v10 = vand.u32 4294901760, %v115_v56  ;;  %v2679_v29 = vld [vmem:[#allocation2] sm:$0xf]  ;;  %v2681_v30 = vld [vmem:[#allocation2 + $0x4] sm:$0xf]  ;;  %p2496_p13 = por %p2495_p12, %p2494_p11 }
  0x44   :  { %3271 = vst [vmem:[#allocation19_spill] sm:$0xff] %v2645_v59  ;;  %v2658_v8 = vsub.f32 %v95_v32, %v790_v38  ;;  %v2660_v9 = vsub.f32 %v96_v33, %v793_v39  ;;  %v160_v11 = vand.u32 4294901760, %v116_v57  ;;  %v2663_v14 = vpack.c.bf16 %v154_v55, %v151_v54  ;;  %3274 = vst [vmem:[#allocation22_spill] sm:$0xff] %v2679_v29  ;;  %v2687_v35 = vld [vmem:[#allocation7 + $0x70] sm:$0xff] }
  0x45   :  { %2106 = vmatpush3.bf16.msra.mxu1 %v2613_v34  ;;  %v2665_v15 = vsub.f32 %v113_v40, %v151_v54  ;;  %v802_v16 = vand.u32 4294901760, %v99_v62  ;;  %v805_v18 = vand.u32 4294901760, %v100_v63  ;;  %v2669_v19 = vsub.f32 %v114_v41, %v154_v55  ;;  %3275 = vst [vmem:[#allocation23_spill] sm:$0xff] %v2681_v30  ;;  %p2497_p0 = pnand %p2496_p13, %p2490_p10 }
  0x46   :  { %2250 = vmatpush3.bf16.msra.mxu0 %v2617_v37  ;;  %2107 = vmatprep.subr.bf16.mxu1 %v3209_v0  ;;  %3272 = vst [vmem:[#allocation20_spill] sm:$0xff] %v2663_v14  ;;  %v2671_v20 = vpack.c.bf16 %v799_v61, %v796_v60  ;;  %v163_v23 = vand.u32 4294901760, %v117_v6  ;;  %v166_v24 = vand.u32 4294901760, %v2656_v7  ;;  %v2675_v25 = vsub.f32 %v97_v46, %v796_v60 }
  0x47   :  { %2251 = vmatprep.subr.bf16.mxu0 %v3209_v0  ;;  %v2677_v26 = vsub.f32 %v98_v47, %v799_v61  ;;  %v808_v27 = vand.u32 4294901760, %v101_v12  ;;  %v811_v28 = vand.u32 4294901760, %v102_v13  ;;  %v2683_v32 = vpack.c.bf16 %v160_v11, %v157_v10  ;;  %v2702_v47 = vld [vmem:[#allocation7 + $0x78] sm:$0xff] }
  0x48   :  { %3273 = vst [vmem:[#allocation21_spill] sm:$0xff] %v2671_v20  ;;  %v2685_v33 = vsub.f32 %v115_v56, %v157_v10  ;;  %v75_v36 = vsel %vm58_vm1, %v2679_v29, -inf  ;;  %v82_v38 = vsel %vm58_vm1, %v2681_v30, -inf  ;;  %v2694_v39 = vsub.f32 %v116_v57, %v160_v11  ;;  %v2710_v56 = vld [vmem:[#allocation5 + $0x70] sm:$0xff]  ;;  %v2712_v57 = vld [vmem:[#allocation5 + $0x78] sm:$0xff] }
  0x49   :  { %2109 = vmatpush3.bf16.msra.mxu1 %v2639_v53  ;;  %3276 = vst [vmem:[#allocation24_spill] sm:$0xff] %v2683_v32  ;;  %v2696_v40 = vpack.c.bf16 %v805_v18, %v802_v16  ;;  %v2698_v41 = vsub.f32 %v99_v62, %v802_v16  ;;  %v2700_v46 = vsub.f32 %v100_v63, %v805_v18  ;;  %v76_v60 = vrot.slane %v75_v36, 4 }
  0x4a   :  { %2253 = vmatpush3.bf16.msra.mxu0 %v2645_v59  ;;  %2110 = vmatprep.subr.bf16.mxu1 %v3209_v0  ;;  %v2706_v54 = vpack.c.bf16 %v166_v24, %v163_v23  ;;  %v2708_v55 = vsub.f32 %v117_v6, %v163_v23  ;;  %v83_v61 = vrot.slane %v82_v38, 4  ;;  %v2715_v62 = vpack.c.bf16 %v811_v28, %v808_v27 }
  0x4b   :  { %2254 = vmatprep.subr.bf16.mxu0 %v3209_v0  ;;  %3277 = vst [vmem:[#allocation25_spill] sm:$0xff] %v2696_v40  ;;  %v59_v10 = vsel %vm58_vm1, %v2679_v29, 0.0  ;;  %v66_v6 = vsel %vm58_vm1, %v2681_v30, 0.0  ;;  %v77_v16 = vmax.f32 %v75_v36, %v76_v60  ;;  %v3280_v29 = vmov 0.0|0.0  }
  0x4c   :  { %3278 = vst [vmem:[#allocation26_spill] sm:$0xff] %v2706_v54  ;;  %3279 = vst [vmem:[#allocation27_spill] sm:$0xff] %v2715_v62  ;;  %v84_v18 = vmax.f32 %v82_v38, %v83_v61  ;;  %v60_v23 = vrot.slane %v59_v10, 4  ;;  %v2732_v38 = vsub.f32 %v2656_v7, %v166_v24  ;;  %v2734_v60 = vsub.f32 %v101_v12, %v808_v27 }
  0x4d   :  { %2112 = vmatpush3.bf16.msra.mxu1 %v2663_v14  ;;  %v78_v59 = vrot.slane %v77_v16, 2  ;;  %v2736_v61 = vsub.f32 %v102_v13, %v811_v28  ;;  %v3282_v1 = vand.u32 4294901760, %v2702_v47  ;;  %v3285_v7 = vand.u32 4294901760, %v2712_v57 }
  0x4e   :  { %2256 = vmatpush3.bf16.msra.mxu0 %v2671_v20  ;;  %2113 = vmatprep.subr.bf16.mxu1 %v3209_v0  ;;  %v67_v20 = vrot.slane %v66_v6, 4  ;;  %v85_v30 = vrot.slane %v84_v18, 2  ;;  %v61_v36 = vadd.f32 %v60_v23, %v59_v10  ;;  %v3284_v10 = vand.u32 4294901760, %v2710_v56 }
  0x4f   :  { %2257 = vmatprep.subr.bf16.mxu0 %v3209_v0  ;;  %v3281_v0 = vand.u32 4294901760, %v2687_v35  ;;  %v3287_v13 = vand.u32 4294901760, %v2619_v42  ;;  %v3229_v23 = vand.u32 4294901760, %v2630_v49  ;;  %v3230_v27 = vand.u32 4294901760, %v2632_v50 }
  0x50   :  { %v68_v63 = vadd.f32 %v67_v20, %v66_v6  ;;  %v86_v14 = vmax.f32 %v84_v18, %v85_v30  ;;  %v62_v11 = vrot.slane %v61_v36, 2  ;;  %v2749_v12 = vpack.c.bf16 %v3285_v7, %v3284_v10 }
  0x51   :  { %2115 = vmatpush3.bf16.msra.mxu1 %v2683_v32  ;;  %v79_v32 = vmax.f32 %v77_v16, %v78_v59  ;;  %v221_v20 = vsub.f32 %v2619_v42, %v3287_v13  ;;  %v3288_v59 = vand.u32 4294901760, %v2621_v43  ;;  %v3228_v16 = vand.u32 4294901760, %v2625_v45 }
  0x52   :  { %2259 = vmatpush3.bf16.msra.mxu0 %v2696_v40  ;;  %2116 = vmatprep.subr.bf16.mxu1 %v3280_v29  ;;  %v2742_v40 = vpack.c.bf16 %v3282_v1, %v3281_v0  ;;  %3286 = vst [vmem:[#allocation29_spill] sm:$0xff] %v2749_v12  ;;  %v69_v24 = vrot.slane %v68_v63, 2  ;;  %v87_v1 = vrot.slane %v86_v14, 1  ;;  %v63_v30 = vadd.f32 %v62_v11, %v61_v36 }
  0x53   :  { %2260 = vmatprep.subr.bf16.mxu0 %v3280_v29  ;;  %v80_v0 = vrot.slane %v79_v32, 1  ;;  %v228_v28 = vsub.f32 %v2621_v43, %v3288_v59  ;;  %v3227_v18 = vand.u32 4294901760, %v2628_v48  ;;  %v3289_v11 = vand.u32 4294901760, %v2623_v44 }
  0x54   :  { %3283 = vst [vmem:[#allocation28_spill] sm:$0xff] %v2742_v40  ;;  %v70_v6 = vadd.f32 %v69_v24, %v68_v63  ;;  %v88_v7 = vmax.f32 %v86_v14, %v87_v1  ;;  %v64_v13 = vrot.slane %v63_v30, 1  ;;  %v873_v59 = vsub.f32 %v2625_v45, %v3228_v16 }
  0x55   :  { %2118 = vmatpush3.bf16.msra.mxu1 %v2706_v54  ;;  %v81_v10 = vmax.f32 %v79_v32, %v80_v0  ;;  %v866_v36 = vsub.f32 %v2623_v44, %v3289_v11  ;;  %v229_v14 = vand.u32 4294901760, %v228_v28  ;;  %v3237_v0 = vand.u32 4294901760, %v2637_v52 }
  0x56   :  { %2262 = vmatpush3.bf16.msra.mxu0 %v2715_v62  ;;  %2119 = vmatprep.subr.bf16.mxu1 %v3280_v29  ;;  %v222_v62 = vand.u32 4294901760, %v221_v20  ;;  %v71_v54 = vrot.slane %v70_v6, 1  ;;  %v65_v24 = vadd.f32 %v64_v13, %v63_v30  ;;  %v242_v28 = vsub.f32 %v2630_v49, %v3229_v23 }
  0x57   :  { %2263 = vmatprep.subr.bf16.mxu0 %v3280_v29  ;;  %v124_v32 = vsel %vm123_vm2, %v88_v7, %v81_v10  ;;  %v235_v10 = vsub.f32 %v2628_v48, %v3227_v18  ;;  %v880_v30 = vsub.f32 %v2632_v50, %v3230_v27  ;;  %v3293_v16 = vand.u32 4294901760, %v2702_v47 }
  0x58   :  { %v2775_v20 = vand.u32 4294901760, %v124_v32  ;;  %v72_v1 = vadd.f32 %v71_v54, %v70_v6  ;;  %v73_v63 = vmul.f32 0.25, %v65_v24  ;;  %v3290_v54 = vand.u32 4294901760, %v2687_v35 }
  0x59   :  { %2121 = vmatpush3.bf16.msra.mxu1 %v2742_v40  ;;  %v3292_v24 = vand.u32 4294901760, %v2634_v51  ;;  %v2804_v23 = vsub.f32 %v2702_v47, %v3293_v16  ;;  %v2123_v11 = vpack.c.bf16 %v229_v14, %v222_v62  ;;  %v867_v27 = vand.u32 4294901760, %v866_v36 }
  0x5a   :  { %2265 = vmatpush3.bf16.msra.mxu0 %v2749_v12  ;;  %2122 = vmatprep.subr.bf16.mxu1 %v3280_v29  ;;  %v2793_v6 = vsub.f32 %v2687_v35, %v3290_v54  ;;  %v2796_v7 = vsub.f32 %v124_v32, %v2775_v20  ;;  %v74_v13 = vmul.f32 0.25, %v72_v1  ;;  %v249_v35 = vsub.f32 %v2637_v52, %v3237_v0 }
  0x5b   :  { %2266 = vmatprep.subr.bf16.mxu0 %v3280_v29  ;;  %v887_v18 = vsub.f32 %v2634_v51, %v3292_v24  ;;  %v874_v1 = vand.u32 4294901760, %v873_v59  ;;  %v3294_v12 = vand.u32 4294901760, %v2641_v58  ;;  %v236_v37 = vand.u32 4294901760, %v235_v10 }
  0x5c   :  { %3291 = vst [vmem:[#allocation30_spill] sm:$0xff] %v2796_v7  ;;  %v3240_v54 = vand.u32 4294901760, %v2796_v7  ;;  %v769_v32 = vsel %vm123_vm2, %v74_v13, %v73_v63  ;;  %v243_v47 = vand.u32 4294901760, %v242_v28  ;;  %v881_v16 = vand.u32 4294901760, %v880_v30 }
  0x5d   :  { %v256_v24 = vsub.f32 %v2641_v58, %v3294_v12  ;;  %v2814_v40 = vand.u32 4294901760, %v769_v32  ;;  %v888_v36 = vand.u32 4294901760, %v887_v18  ;;  %v250_v59 = vand.u32 4294901760, %v249_v35 }
  0x5e   :  { %v210_v62 = vsub.f32 %v2796_v7, %v3240_v54  ;;  %v3242_v13 = vand.u32 4294901760, %v2654_v5  ;;  %v3245_v53 = vand.u32 4294901760, %v2660_v9  ;;  %v3297_v18 = vand.u32 4294901760, %v2710_v56 }
  0x5f   :  { %3295 = vst [vmem:[#allocation31_spill] sm:$0xff] %v2814_v40  ;;  %v2822_v63 = vsub.f32 %v769_v32, %v2814_v40  ;;  %v257_v28 = vand.u32 4294901760, %v256_v24  ;;  %v2267_v32 = vpack.c.bf16 %v874_v1, %v867_v27  ;;  %v3246_v35 = vand.u32 4294901760, %v2665_v15 }
  0x60   :  { %v211_v10 = vand.u32 4294901760, %v210_v62  ;;  %v2831_v54 = vsub.f32 %v2710_v56, %v3297_v18  ;;  %v2126_v12 = vpack.c.bf16 %v243_v47, %v236_v37  ;;  %v2270_v14 = vpack.c.bf16 %v888_v36, %v881_v16 }
  0x61   :  { %3296 = vst [vmem:[#allocation32_spill] sm:$0xff] %v2822_v63  ;;  %v3241_v0 = vand.u32 4294901760, %v2822_v63  ;;  %v3298_v62 = vand.u32 4294901760, %v2647_v2  ;;  %v3249_v30 = vand.u32 4294901760, %v2669_v19  ;;  %v3299_v18 = vand.u32 4294901760, %v2652_v4 }
  0x62   :  { %1711 = vmatmul.mubr.f32.vlgmr.msra.gmra.mrb[0].mxu1 %v211_v10  ;;  %v270_v37 = vsub.f32 %v2654_v5, %v3242_v13  ;;  %v3300_v1 = vmov 0.0   ;;  %v2129_v47 = vpack.c.bf16 %v257_v28, %v250_v59  ;;  %v3302_v36 = vand.u32 4294901760, %v2658_v8 }
  0x63   :  { %v894_v24 = vsub.f32 %v2647_v2, %v3298_v62  ;;  %2124 = vmatpush3.bf16.msra.mxu1 %v2123_v11  ;;  %v855_v56 = vsub.f32 %v2822_v63, %v3241_v0  ;;  %v263_v27 = vsub.f32 %v2652_v4, %v3299_v18  ;;  %1745 = vmatprep.mubr.msk.f32.mxu1 %vm2525_vm0, %v3300_v1  ;;  %v3301_v11 = vand.u32 4294901760, %v2649_v3 }
  0x64   :  { %2125 = vmatprep.subr.bf16.mxu1 %v3280_v29  ;;  %v908_v10 = vsub.f32 %v2658_v8, %v3302_v36  ;;  %v915_v62 = vsub.f32 %v2660_v9, %v3245_v53  ;;  %v277_v0 = vsub.f32 %v2665_v15, %v3246_v35  ;;  %v284_v28 = vsub.f32 %v2669_v19, %v3249_v30 }
  0x65   :  { %v901_v16 = vsub.f32 %v2649_v3, %v3301_v11  ;;  %v856_v18 = vand.u32 4294901760, %v855_v56  ;;  %v264_v56 = vand.u32 4294901760, %v263_v27  ;;  %v271_v53 = vand.u32 4294901760, %v270_v37 }
  0x66   :  { %v3255_v35 = vand.u32 4294901760, %v2700_v46  ;;  %v3254_v13 = vand.u32 4294901760, %v2708_v55  ;;  %v895_v59 = vand.u32 4294901760, %v894_v24  ;;  %v909_v30 = vand.u32 4294901760, %v908_v10 }
  0x67   :  { %1921 = vmatmul.mubr.f32.vlgmr.msra.gmra.mrb[0].mxu0 %v856_v18  ;;  %2127 = vmatpush3.bf16.msra.mxu1 %v2126_v12  ;;  %v902_v34 = vand.u32 4294901760, %v901_v16  ;;  %v916_v36 = vand.u32 4294901760, %v915_v62  ;;  %v278_v31 = vand.u32 4294901760, %v277_v0  ;;  %v3303_v12 = vand.u32 4294901760, %v2675_v25 }
  0x68   :  { %2268 = vmatpush3.bf16.msra.mxu0 %v2267_v32  ;;  %2128 = vmatprep.subr.bf16.mxu1 %v3280_v29  ;;  %v3304_v37 = vand.u32 4294901760, %v2677_v26  ;;  %v285_v32 = vand.u32 4294901760, %v284_v28  ;;  %v3305_v24 = vand.u32 4294901760, %v2685_v33  ;;  %v3306_v10 = vand.u32 4294901760, %v2694_v39 }
  0x69   :  { %2269 = vmatprep.subr.bf16.mxu0 %v3280_v29  ;;  %v922_v27 = vsub.f32 %v2675_v25, %v3303_v12  ;;  %1955 = vmatprep.mubr.msk.f32.mxu0 %vm2525_vm0, %v3300_v1  ;;  %v3307_v62 = vand.u32 4294901760, %v2698_v41  ;;  %v2132_v11 = vpack.c.bf16 %v271_v53, %v264_v56  ;;  %v305_v28 = vsub.f32 %v2708_v55, %v3254_v13 }
  0x6a   :  { %v929_v18 = vsub.f32 %v2677_v26, %v3304_v37  ;;  %v291_v16 = vsub.f32 %v2685_v33, %v3305_v24  ;;  %v298_v0 = vsub.f32 %v2694_v39, %v3306_v10  ;;  %v943_v37 = vsub.f32 %v2700_v46, %v3255_v35 }
  0x6b   :  { %v936_v12 = vsub.f32 %v2698_v41, %v3307_v62  ;;  %2130 = vmatpush3.bf16.msra.mxu1 %v2129_v47  ;;  %v949_v24 = vand.u32 4294901760, %v2734_v60  ;;  %v3308_v21 = vand.u32 4294901760, %v2712_v57  ;;  %v2273_v22 = vpack.c.bf16 %v902_v34, %v895_v59 }
  0x6c   :  { %2271 = vmatpush3.bf16.msra.mxu0 %v2270_v14  ;;  %2131 = vmatprep.subr.bf16.mxu1 %v3280_v29  ;;  %v3309_v53 = vand.u32 4294901760, %v2732_v38  ;;  %v318_v56 = vand.u32 4294901760, %v2793_v6  ;;  %v2276_v62 = vpack.c.bf16 %v916_v36, %v909_v30  ;;  %v923_v13 = vand.u32 4294901760, %v922_v27 }
  0x6d   :  { %v2903_v10 = vsub.f32 %v2712_v57, %v3308_v21  ;;  %2272 = vmatprep.subr.bf16.mxu0 %v3280_v29  ;;  %v930_v35 = vand.u32 4294901760, %v929_v18  ;;  %v325_v63 = vand.u32 4294901760, %v2804_v23  ;;  %v2135_v17 = vpack.c.bf16 %v285_v32, %v278_v31 }
  0x6e   :  { %v312_v47 = vsub.f32 %v2732_v38, %v3309_v53  ;;  %v292_v21 = vand.u32 4294901760, %v291_v16  ;;  %v299_v57 = vand.u32 4294901760, %v298_v0  ;;  %v937_v14 = vand.u32 4294901760, %v936_v12 }
  0x6f   :  { %2133 = vmatpush3.bf16.msra.mxu1 %v2132_v11  ;;  %v944_v34 = vand.u32 4294901760, %v943_v37  ;;  %v306_v59 = vand.u32 4294901760, %v305_v28  ;;  %v950_v7 = vsub.f32 %v2734_v60, %v949_v24  ;;  %v956_v53 = vand.u32 4294901760, %v2736_v61 }
  0x70   :  { %2274 = vmatpush3.bf16.msra.mxu0 %v2273_v22  ;;  %2134 = vmatprep.subr.bf16.mxu1 %v3280_v29  ;;  %v313_v40 = vand.u32 4294901760, %v312_v47  ;;  %v319_v30 = vsub.f32 %v2793_v6, %v318_v56  ;;  %v963_v36 = vand.u32 4294901760, %v2831_v54  ;;  %v970_v31 = vand.u32 4294901760, %v2903_v10 }
  0x71   :  { %2275 = vmatprep.subr.bf16.mxu0 %v3280_v29  ;;  %v326_v11 = vsub.f32 %v2804_v23, %v325_v63  ;;  %v2279_v27 = vpack.c.bf16 %v930_v35, %v923_v13  ;;  %v2138_v18 = vpack.c.bf16 %v299_v57, %v292_v21  ;;  %v2282_v32 = vpack.c.bf16 %v944_v34, %v937_v14 }
  0x72   :  { %v951_v16 = vand.u32 4294901760, %v950_v7  ;;  %v957_v22 = vsub.f32 %v2736_v61, %v956_v53  ;;  %v2141_v0 = vpack.c.bf16 %v313_v40, %v306_v59  ;;  %v320_v12 = vand.u32 4294901760, %v319_v30 }
  0x73   :  { %2136 = vmatpush3.bf16.msra.mxu1 %v2135_v17  ;;  %v964_v37 = vsub.f32 %v2831_v54, %v963_v36  ;;  %v971_v28 = vsub.f32 %v2903_v10, %v970_v31  ;;  %v327_v47 = vand.u32 4294901760, %v326_v11  ;;  %v3310_v13 = vand.u32 4294901760, %v2619_v42 }
  0x74   :  { %2277 = vmatpush3.bf16.msra.mxu0 %v2276_v62  ;;  %2137 = vmatprep.subr.bf16.mxu1 %v3280_v29  ;;  %v3311_v17 = vand.u32 4294901760, %v2621_v43  ;;  %v3312_v7 = vand.u32 4294901760, %v2623_v44  ;;  %v3313_v62 = vand.u32 4294901760, %v2625_v45  ;;  %v3315_v40 = vand.u32 4294901760, %v2628_v48 }
  0x75   :  { %2278 = vmatprep.subr.bf16.mxu0 %v3280_v29  ;;  %v3316_v57 = vand.u32 4294901760, %v2630_v49  ;;  %v3318_v34 = vand.u32 4294901760, %v2632_v50  ;;  %v3319_v59 = vand.u32 4294901760, %v2634_v51  ;;  %v3321_v11 = vand.u32 4294901760, %v2637_v52 }
  0x76   :  { %v2929_v35 = vpack.c.bf16 %v3311_v17, %v3310_v13  ;;  %v2935_v21 = vpack.c.bf16 %v3313_v62, %v3312_v7  ;;  %v3322_v13 = vand.u32 4294901760, %v2641_v58  ;;  %v3324_v7 = vand.u32 4294901760, %v2647_v2 }
  0x77   :  { %v2941_v14 = vpack.c.bf16 %v3316_v57, %v3315_v40  ;;  %v2947_v30 = vpack.c.bf16 %v3319_v59, %v3318_v34  ;;  %v3325_v62 = vand.u32 4294901760, %v2649_v3  ;;  %v3327_v40 = vand.u32 4294901760, %v2652_v4  ;;  %2139 = vmatpush3.bf16.msra.mxu1 %v2138_v18 }
  0x78   :  { %3314 = vst [vmem:[#allocation33_spill] sm:$0xff] %v2935_v21  ;;  %v2953_v17 = vpack.c.bf16 %v3322_v13, %v3321_v11  ;;  %v3328_v57 = vand.u32 4294901760, %v2654_v5  ;;  %v3329_v34 = vand.u32 4294901760, %v2658_v8  ;;  %v3330_v59 = vand.u32 4294901760, %v2660_v9  ;;  %2280 = vmatpush3.bf16.msra.mxu0 %v2279_v27  ;;  %2140 = vmatprep.subr.bf16.mxu1 %v3280_v29 }
  0x79   :  { %3317 = vst [vmem:[#allocation34_spill] sm:$0xff] %v2941_v14  ;;  %3320 = vst [vmem:[#allocation35_spill] sm:$0xff] %v2947_v30  ;;  %v2959_v21 = vpack.c.bf16 %v3325_v62, %v3324_v7  ;;  %v3332_v11 = vand.u32 4294901760, %v2665_v15  ;;  %v3333_v13 = vand.u32 4294901760, %v2669_v19  ;;  %v3334_v7 = vand.u32 4294901760, %v2675_v25  ;;  %2281 = vmatprep.subr.bf16.mxu0 %v3280_v29 }
  0x7a   :  { %3323 = vst [vmem:[#allocation36_spill] sm:$0xff] %v2953_v17  ;;  %v2965_v14 = vpack.c.bf16 %v3328_v57, %v3327_v40  ;;  %v2971_v30 = vpack.c.bf16 %v3330_v59, %v3329_v34  ;;  %v3335_v62 = vand.u32 4294901760, %v2677_v26  ;;  %v3337_v18 = vand.u32 4294901760, %v2685_v33 }
  0x7b   :  { %3326 = vst [vmem:[#allocation37_spill] sm:$0xff] %v2959_v21  ;;  %v2977_v17 = vpack.c.bf16 %v3333_v13, %v3332_v11  ;;  %v3338_v40 = vand.u32 4294901760, %v2694_v39  ;;  %v958_v34 = vand.u32 4294901760, %v957_v22  ;;  %v3339_v59 = vand.u32 4294901760, %v2698_v41  ;;  %2142 = vmatpush3.bf16.msra.mxu1 %v2141_v0 }
  0x7c   :  { %3331 = vst [vmem:[#allocation38_spill] sm:$0xff] %v2971_v30  ;;  %v2983_v21 = vpack.c.bf16 %v3335_v62, %v3334_v7  ;;  %v3340_v11 = vand.u32 4294901760, %v2700_v46  ;;  %v3341_v30 = vand.u32 4294901760, %v2708_v55  ;;  %v3342_v7 = vand.u32 4294901760, %v2732_v38  ;;  %2283 = vmatpush3.bf16.msra.mxu0 %v2282_v32  ;;  %2143 = vmatprep.subr.bf16.mxu1 %v3280_v29 }
  0x7d   :  { %v2989_v57 = vpack.c.bf16 %v3338_v40, %v3337_v18  ;;  %v3007_v27 = vpack.c.bf16 %v325_v63, %v318_v56  ;;  %v3009_v18 = vpack.c.bf16 %v970_v31, %v963_v36  ;;  %v2144_v22 = vpack.c.bf16 %v327_v47, %v320_v12  ;;  %2284 = vmatprep.subr.bf16.mxu0 %v3280_v29  ;;  %v3362_v36 = vld [vmem:[#allocation29_spill] sm:$0xff] }
  0x7e   :  { %3336 = vst [vmem:[#allocation39_spill] sm:$0xff] %v2983_v21  ;;  %v2996_v13 = vpack.c.bf16 %v3340_v11, %v3339_v59  ;;  %v3002_v62 = vpack.c.bf16 %v3342_v7, %v3341_v30  ;;  %v3004_v21 = vpack.c.bf16 %v956_v53, %v949_v24  ;;  %v2285_v40 = vpack.c.bf16 %v958_v34, %v951_v16 }
  0x7f   :  { %v965_v59 = vand.u32 4294901760, %v964_v37  ;;  %v972_v11 = vand.u32 4294901760, %v971_v28  ;;  %2145 = vmatpush3.bf16.msra.mxu1 %v2144_v22  ;;  %v2147_v24 = vpack.c.bf16 %v2621_v43, %v2619_v42  ;;  %v2150_v63 = vpack.c.bf16 %v2630_v49, %v2628_v48  ;;  %v3343_v42 = vld [vmem:[#allocation31_spill] sm:$0xff]  ;;  %v3365_v16 = vld [vmem:[#allocation33_spill] sm:$0xff] }
  0x80   :  { %2286 = vmatpush3.bf16.msra.mxu0 %v2285_v40  ;;  %2146 = vmatprep.subr.bf16.mxu1 %v3280_v29  ;;  %v2291_v56 = vpack.c.bf16 %v2625_v45, %v2623_v44  ;;  %v2153_v43 = vpack.c.bf16 %v2641_v58, %v2637_v52  ;;  %v2294_v48 = vpack.c.bf16 %v2634_v51, %v2632_v50  ;;  %v3364_v32 = vld [vmem:[#allocation34_spill] sm:$0xff]  ;;  %v3367_v12 = vld [vmem:[#allocation35_spill] sm:$0xff] }
  0x81   :  { %v2288_v53 = vpack.c.bf16 %v972_v11, %v965_v59  ;;  %2287 = vmatprep.subr.bf16.mxu0 %v3280_v29  ;;  %v2156_v44 = vpack.c.bf16 %v2654_v5, %v2652_v4  ;;  %v2297_v45 = vpack.c.bf16 %v2649_v3, %v2647_v2  ;;  %v2159_v49 = vpack.c.bf16 %v2669_v19, %v2665_v15  ;;  %v3346_v15 = vld [vmem:[#allocation32_spill] sm:$0xff]  ;;  %v3347_v19 = vld [vmem:[#allocation14_spill] sm:$0xff] }
  0x82   :  { %1746 = vmatmul.mubr.f32.vlgmr.msra.gmra.mrb[0].mxu1 %v2775_v20  ;;  %v2300_v50 = vpack.c.bf16 %v2660_v9, %v2658_v8  ;;  %v2162_v51 = vpack.c.bf16 %v2694_v39, %v2685_v33  ;;  %v2303_v52 = vpack.c.bf16 %v2677_v26, %v2675_v25  ;;  %v2165_v58 = vpack.c.bf16 %v2732_v38, %v2708_v55  ;;  %v3344_v8 = vld [vmem:[#allocation30_spill] sm:$0xff]  ;;  %v3345_v9 = vld [vmem:[#allocation12_spill] sm:$0xff]  ;;  %v3348_v25 = vld [vmem:[#allocation13_spill] sm:$0xff] }
  0x83   :  { %2148 = vmatpush3.bf16.msra.mxu1 %v2147_v24  ;;  %1780 = vmatprep.mubr.msk.f32.mxu1 %vm2525_vm0, %v3300_v1  ;;  %v2306_v2 = vpack.c.bf16 %v2700_v46, %v2698_v41  ;;  %v2168_v3 = vpack.c.bf16 %v2804_v23, %v2793_v6  ;;  %v2309_v4 = vpack.c.bf16 %v2736_v61, %v2734_v60  ;;  %v3349_v26 = vld [vmem:[#allocation16_spill] sm:$0xff]  ;;  %v3350_v33 = vld [vmem:[#allocation15_spill] sm:$0xff]  ;;  %v3351_v39 = vld [vmem:[#allocation18_spill] sm:$0xff]  ;;  %v3363_v31 = vand.u32 4294901760, %v3346_v15 }
  0x84   :  { %2289 = vmatpush3.bf16.msra.mxu0 %v2288_v53  ;;  %2149 = vmatprep.subr.bf16.mxu1 %v3280_v29  ;;  %v2312_v5 = vpack.c.bf16 %v2903_v10, %v2831_v54  ;;  %v3352_v41 = vld [vmem:[#allocation17_spill] sm:$0xff]  ;;  %v3353_v46 = vld [vmem:[#allocation20_spill] sm:$0xff]  ;;  %v3354_v55 = vld [vmem:[#allocation19_spill] sm:$0xff]  ;;  %v3361_v10 = vand.u32 4294901760, %v3344_v8 }
  0x85   :  { %2290 = vmatprep.subr.bf16.mxu0 %v3280_v29  ;;  %v3355_v38 = vld [vmem:[#allocation24_spill] sm:$0xff]  ;;  %v3356_v60 = vld [vmem:[#allocation21_spill] sm:$0xff]  ;;  %v3357_v61 = vld [vmem:[#allocation26_spill] sm:$0xff] }
  0x86   :  { %v3358_v23 = vld [vmem:[#allocation25_spill] sm:$0xff]  ;;  %v3359_v6 = vld [vmem:[#allocation28_spill] sm:$0xff]  ;;  %v3360_v54 = vld [vmem:[#allocation27_spill] sm:$0xff] }
  0x87   :  { %1956 = vmatmul.mubr.f32.vlgmr.msra.gmra.mrb[0].mxu0 %v3343_v42  ;;  %2151 = vmatpush3.bf16.msra.mxu1 %v2150_v63  ;;  %v3366_v0 = vld [vmem:[#allocation36_spill] sm:$0xff]  ;;  %v3368_v37 = vld [vmem:[#allocation37_spill] sm:$0xff]  ;;  %v3369_v28 = vld [vmem:[#allocation38_spill] sm:$0xff] }
  0x88   :  { %2292 = vmatpush3.bf16.msra.mxu0 %v2291_v56  ;;  %2152 = vmatprep.subr.bf16.mxu1 %v3280_v29  ;;  %v3370_v47 = vld [vmem:[#allocation39_spill] sm:$0xff]  ;;  %v3371_v56 = vld [vmem:[#allocation22_spill] sm:$0xff] }
  0x89   :  { %2293 = vmatprep.subr.bf16.mxu0 %v3280_v29  ;;  %1990 = vmatprep.mubr.msk.f32.mxu0 %vm2525_vm0, %v3300_v1 }
  0x8b   :  { %2154 = vmatpush3.bf16.msra.mxu1 %v2153_v43  ;;  %v3372_v43 = vld [vmem:[#allocation23_spill] sm:$0xff] }
  0x8c   :  { %2295 = vmatpush3.bf16.msra.mxu0 %v2294_v48  ;;  %2155 = vmatprep.subr.bf16.mxu1 %v3280_v29 }
  0x8d   :  { %2296 = vmatprep.subr.bf16.mxu0 %v3280_v29 }
  0x8f   :  { %2157 = vmatpush3.bf16.msra.mxu1 %v2156_v44 }
  0x90   :  { %2298 = vmatpush3.bf16.msra.mxu0 %v2297_v45  ;;  %2158 = vmatprep.subr.bf16.mxu1 %v3280_v29 }
  0x91   :  { %2299 = vmatprep.subr.bf16.mxu0 %v3280_v29 }
  0x93   :  { %2160 = vmatpush3.bf16.msra.mxu1 %v2159_v49 }
  0x94   :  { %2301 = vmatpush3.bf16.msra.mxu0 %v2300_v50  ;;  %2161 = vmatprep.subr.bf16.mxu1 %v3280_v29 }
  0x95   :  { %2302 = vmatprep.subr.bf16.mxu0 %v3280_v29 }
  0x97   :  { %2163 = vmatpush3.bf16.msra.mxu1 %v2162_v51 }
  0x98   :  { %2304 = vmatpush3.bf16.msra.mxu0 %v2303_v52  ;;  %2164 = vmatprep.subr.bf16.mxu1 %v3280_v29 }
  0x99   :  { %2305 = vmatprep.subr.bf16.mxu0 %v3280_v29 }
  0x9b   :  { %2166 = vmatpush3.bf16.msra.mxu1 %v2165_v58 }
  0x9c   :  { %2307 = vmatpush3.bf16.msra.mxu0 %v2306_v2  ;;  %2167 = vmatprep.subr.bf16.mxu1 %v3280_v29 }
  0x9d   :  { %2308 = vmatprep.subr.bf16.mxu0 %v3280_v29 }
  0x9f   :  { %2169 = vmatpush3.bf16.msra.mxu1 %v2168_v3 }
  0xa0   :  { %2310 = vmatpush3.bf16.msra.mxu0 %v2309_v4  ;;  %2170 = vmatprep.subr.bf16.mxu1 %v3280_v29 }
  0xa1   :  { %2311 = vmatprep.subr.bf16.mxu0 %v3280_v29 }
  0xa2   :  { %1781 = vmatmul.mubr.f32.vlgmr.msra.gmra.mrb[0].mxu1 %v3344_v8 }
  0xa3   :  { %2172 = vmatpush3.bf16.msra.mxu1 %v3345_v9  ;;  %1815 = vmatprep.mubr.msk.f32.mxu1 %vm2525_vm0, %v3300_v1 }
  0xa4   :  { %2313 = vmatpush3.bf16.msra.mxu0 %v2312_v5  ;;  %2173 = vmatprep.subr.bf16.mxu1 %v3280_v29 }
  0xa5   :  { %2314 = vmatprep.subr.bf16.mxu0 %v3280_v29 }
  0xa7   :  { %1991 = vmatmul.mubr.f32.vlgmr.msra.gmra.mrb[0].mxu0 %v3346_v15  ;;  %2175 = vmatpush3.bf16.msra.mxu1 %v3347_v19 }
  0xa8   :  { %2316 = vmatpush3.bf16.msra.mxu0 %v3348_v25  ;;  %2176 = vmatprep.subr.bf16.mxu1 %v3280_v29 }
  0xa9   :  { %2317 = vmatprep.subr.bf16.mxu0 %v3280_v29  ;;  %2025 = vmatprep.mubr.msk.f32.mxu0 %vm2525_vm0, %v3300_v1 }
  0xab   :  { %2178 = vmatpush3.bf16.msra.mxu1 %v3349_v26 }
  0xac   :  { %2319 = vmatpush3.bf16.msra.mxu0 %v3350_v33  ;;  %2179 = vmatprep.subr.bf16.mxu1 %v3280_v29 }
  0xad   :  { %2320 = vmatprep.subr.bf16.mxu0 %v3280_v29 }
  0xaf   :  { %2181 = vmatpush3.bf16.msra.mxu1 %v3351_v39 }
  0xb0   :  { %2322 = vmatpush3.bf16.msra.mxu0 %v3352_v41  ;;  %2182 = vmatprep.subr.bf16.mxu1 %v3280_v29 }
  0xb1   :  { %2323 = vmatprep.subr.bf16.mxu0 %v3280_v29 }
  0xb3   :  { %2184 = vmatpush3.bf16.msra.mxu1 %v3353_v46 }
  0xb4   :  { %2325 = vmatpush3.bf16.msra.mxu0 %v3354_v55  ;;  %2185 = vmatprep.subr.bf16.mxu1 %v3280_v29 }
  0xb5   :  { %2326 = vmatprep.subr.bf16.mxu0 %v3280_v29 }
  0xb7   :  { %2187 = vmatpush3.bf16.msra.mxu1 %v3355_v38 }
  0xb8   :  { %2328 = vmatpush3.bf16.msra.mxu0 %v3356_v60  ;;  %2188 = vmatprep.subr.bf16.mxu1 %v3280_v29 }
  0xb9   :  { %2329 = vmatprep.subr.bf16.mxu0 %v3280_v29 }
  0xbb   :  { %2190 = vmatpush3.bf16.msra.mxu1 %v3357_v61 }
  0xbc   :  { %2331 = vmatpush3.bf16.msra.mxu0 %v3358_v23  ;;  %2191 = vmatprep.subr.bf16.mxu1 %v3280_v29 }
  0xbd   :  { %2332 = vmatprep.subr.bf16.mxu0 %v3280_v29 }
  0xbf   :  { %2193 = vmatpush3.bf16.msra.mxu1 %v3359_v6 }
  0xc0   :  { %2334 = vmatpush3.bf16.msra.mxu0 %v3360_v54  ;;  %2194 = vmatprep.subr.bf16.mxu1 %v3280_v29 }
  0xc1   :  { %2335 = vmatprep.subr.bf16.mxu0 %v3280_v29 }
  0xc2   :  { %1816 = vmatmul.mubr.f32.vlgmr.msra.gmra.mrb[0].mxu1 %v3361_v10 }
  0xc3   :  { %2196 = vmatpush3.bf16.msra.mxu1 %v2929_v35  ;;  %1850 = vmatprep.mubr.msk.f32.mxu1 %vm2525_vm0, %v3300_v1 }
  0xc4   :  { %2337 = vmatpush3.bf16.msra.mxu0 %v3362_v36  ;;  %2197 = vmatprep.subr.bf16.mxu1 %v3280_v29 }
  0xc5   :  { %2338 = vmatprep.subr.bf16.mxu0 %v3280_v29 }
  0xc7   :  { %2026 = vmatmul.mubr.f32.vlgmr.msra.gmra.mrb[0].mxu0 %v3363_v31  ;;  %2199 = vmatpush3.bf16.msra.mxu1 %v3364_v32 }
  0xc8   :  { %2340 = vmatpush3.bf16.msra.mxu0 %v3365_v16  ;;  %2200 = vmatprep.subr.bf16.mxu1 %v3280_v29 }
  0xc9   :  { %2341 = vmatprep.subr.bf16.mxu0 %v3280_v29  ;;  %2060 = vmatprep.mubr.msk.f32.mxu0 %vm2525_vm0, %v3300_v1 }
  0xcb   :  { %2202 = vmatpush3.bf16.msra.mxu1 %v3366_v0 }
  0xcc   :  { %2343 = vmatpush3.bf16.msra.mxu0 %v3367_v12  ;;  %2203 = vmatprep.subr.bf16.mxu1 %v3280_v29 }
  0xcd   :  { %2344 = vmatprep.subr.bf16.mxu0 %v3280_v29 }
  0xcf   :  { %2205 = vmatpush3.bf16.msra.mxu1 %v2965_v14 }
  0xd0   :  { %2346 = vmatpush3.bf16.msra.mxu0 %v3368_v37  ;;  %2206 = vmatprep.subr.bf16.mxu1 %v3280_v29 }
  0xd1   :  { %2347 = vmatprep.subr.bf16.mxu0 %v3280_v29 }
  0xd3   :  { %2208 = vmatpush3.bf16.msra.mxu1 %v2977_v17 }
  0xd4   :  { %2349 = vmatpush3.bf16.msra.mxu0 %v3369_v28  ;;  %2209 = vmatprep.subr.bf16.mxu1 %v3280_v29 }
  0xd5   :  { %2350 = vmatprep.subr.bf16.mxu0 %v3280_v29 }
  0xd7   :  { %2211 = vmatpush3.bf16.msra.mxu1 %v2989_v57 }
  0xd8   :  { %2352 = vmatpush3.bf16.msra.mxu0 %v3370_v47  ;;  %2212 = vmatprep.subr.bf16.mxu1 %v3280_v29 }
  0xd9   :  { %2353 = vmatprep.subr.bf16.mxu0 %v3280_v29 }
  0xdb   :  { %2214 = vmatpush3.bf16.msra.mxu1 %v3002_v62  ;;  %v1422_v62 = vlaneseq }
  0xdc   :  { %2355 = vmatpush3.bf16.msra.mxu0 %v2996_v13  ;;  %2215 = vmatprep.subr.bf16.mxu1 %v3280_v29  ;;  %v2527_v13 = vmov 1966171168  }
  0xdd   :  { %2356 = vmatprep.subr.bf16.mxu0 %v3280_v29  ;;  %v1420_v7 = vunpack.c.l.s4 %v2527_v13 }
  0xdf   :  { %2217 = vmatpush3.bf16.msra.mxu1 %v3007_v27  ;;  %v1423_v27 = vshrl.u32 %v1422_v62, 7 }
  0xe0   :  { %2358 = vmatpush3.bf16.msra.mxu0 %v3004_v21  ;;  %2218 = vmatprep.subr.bf16.mxu1 %v3280_v29 }
  0xe1   :  { %2359 = vmatprep.subr.bf16.mxu0 %v3280_v29  ;;  %v1443_v40 = vsub.s32 0, %v1423_v27 }
  0xe2   :  { %1851 = vmatmul.mubr.f32.vlgmr.msra.gmra.mrb[0].mxu1 %v2775_v20 }
  0xe3   :  { %2220 = vmatpush3.bf16.msra.mxu1 %v3345_v9  ;;  %1885 = vmatprep.mubr.msk.f32.mxu1 %vm2525_vm0, %v3300_v1 }
  0xe4   :  { %2361 = vmatpush3.bf16.msra.mxu0 %v3009_v18  ;;  %2221 = vmatprep.subr.bf16.mxu1 %v3280_v29 }
  0xe5   :  { %2362 = vmatprep.subr.bf16.mxu0 %v3280_v29 }
  0xe7   :  { %2061 = vmatmul.mubr.f32.vlgmr.msra.gmra.mrb[0].mxu0 %v3343_v42  ;;  %2223 = vmatpush3.bf16.msra.mxu1 %v3347_v19 }
  0xe8   :  { %2364 = vmatpush3.bf16.msra.mxu0 %v3348_v25  ;;  %2224 = vmatprep.subr.bf16.mxu1 %v3280_v29 }
  0xe9   :  { %2365 = vmatprep.subr.bf16.mxu0 %v3280_v29  ;;  %2095 = vmatprep.mubr.msk.f32.mxu0 %vm2525_vm0, %v3300_v1 }
  0xeb   :  { %2226 = vmatpush3.bf16.msra.mxu1 %v3349_v26 }
  0xec   :  { %2367 = vmatpush3.bf16.msra.mxu0 %v3350_v33  ;;  %2227 = vmatprep.subr.bf16.mxu1 %v3280_v29 }
  0xed   :  { %2368 = vmatprep.subr.bf16.mxu0 %v3280_v29 }
  0xef   :  { %2229 = vmatpush3.bf16.msra.mxu1 %v3351_v39 }
  0xf0   :  { %2370 = vmatpush3.bf16.msra.mxu0 %v3352_v41  ;;  %2230 = vmatprep.subr.bf16.mxu1 %v3280_v29 }
  0xf1   :  { %2371 = vmatprep.subr.bf16.mxu0 %v3280_v29 }
  0xf3   :  { %2232 = vmatpush3.bf16.msra.mxu1 %v3353_v46 }
  0xf4   :  { %2373 = vmatpush3.bf16.msra.mxu0 %v3354_v55  ;;  %2233 = vmatprep.subr.bf16.mxu1 %v3280_v29 }
  0xf5   :  { %2374 = vmatprep.subr.bf16.mxu0 %v3280_v29 }
  0xf7   :  { %2235 = vmatpush3.bf16.msra.mxu1 %v3355_v38 }
  0xf8   :  { %2376 = vmatpush3.bf16.msra.mxu0 %v3356_v60  ;;  %2236 = vmatprep.subr.bf16.mxu1 %v3280_v29 }
  0xf9   :  { %2377 = vmatprep.subr.bf16.mxu0 %v3280_v29 }
  0xfb   :  { %2238 = vmatpush3.bf16.msra.mxu1 %v3357_v61 }
  0xfc   :  { %2379 = vmatpush3.bf16.msra.mxu0 %v3358_v23  ;;  %2239 = vmatprep.subr.bf16.mxu1 %v3280_v29 }
  0xfd   :  { %2380 = vmatprep.subr.bf16.mxu0 %v3280_v29 }
  0xff   :  { %2241 = vmatpush3.bf16.msra.mxu1 %v3359_v6 }
 0x100   :  { %2382 = vmatpush3.bf16.msra.mxu0 %v3360_v54 }
 0x101   :  { %2383 = vmatprep.subr.bf16.mxu0 %v3280_v29  ;;  %v1421_v29 = vunpack.c.0.s8 %v1420_v7 }
 0x102   :  { %1886 = vmatmul.mubr.f32.vlgmr.msra.gmra.mrb[0].mxu1 %v2775_v20 }
 0x103   :  { %v1424_v20 = vsub.s32 %v1421_v29, %v1423_v27 }
 0x104   :  { %2385 = vmatpush3.bf16.msra.mxu0 %v3362_v36 }
 0x107   :  { %2096 = vmatmul.mubr.f32.vlgmr.msra.gmra.mrb[0].mxu0 %v3343_v42 }
 0x1d5   :  { %v763_v1 = vpop.f32.mrb[0].mxu1 }
 0x1d6   :  { %v1887_v35 = vpop.f32.mrb[1].mxu1 }
 0x1da   :  { %v1408_v21 = vpop.f32.mrb[0].mxu0 }
 0x1db   :  { %v2386_v14 = vadd.f32 %v1408_v21, %v763_v1  ;;  %v2097_v30 = vpop.f32.mrb[1].mxu0 }
 0x1dd   :  { %v1473_v17 = vmul.f32 -1.442695, %v2386_v14 }
 0x1df   :  { %2419 = vpow2.f32 %v1473_v17 }
 0x1e9   :  { %v2420_v57 = vpop.eup %2419 }
 0x1ea   :  { %v1415_v34 = vadd.f32 1.0, %v2420_v57 }
 0x1ec   :  { %2421 = vrcp.f32 %v1415_v34 }
 0x1f6   :  { %v2422_v18 = vpop.eup %2421 }
 0x1f7   :  { %v1425_v22 = vrot.slane %v2422_v18, %v1424_v20 }
 0x1f9   :  { %v1426_v59 = vcombine.high %v1425_v22, %v1425_v22  ;;  %v1433_v11 = vrot.slane %v1425_v22, %v1424_v20 }
 0x1fb   :  { %v1440_v24 = vrot.slane %v1426_v59, %v1424_v20  ;;  %v1444_v53 = vrot.slane %v1433_v11, %v1443_v40 }
 0x1fd   :  { %v1448_v63 = vrot.slane %v1440_v24, %v1443_v40  ;;  %v1451_v42 = vmul.f32 %v1444_v53, %v3371_v56 }
 0x1ff   :  { %v1452_v48 = vmul.f32 %v1448_v63, %v3372_v43  ;;  %1453 = vst [vmem:[#allocation8] sm:$0xf] %v1451_v42 }
 0x201   :  { %1454 = vst [vmem:[#allocation8 + $0x4] sm:$0xf] %v1452_v48 }
 0x202   :  { %2500 = shalt.err (!%p2497_p0)
}
 0x203   :  { %s2501_s27 = scalar_lea.hbm %s3206_s3, 128 }
 0x204   :  { %p2502_p1 = scmp.ne.s32.totalorder %s3206_s3, %s2501_s27  ;;  %p2505_p2 = scmp.lt.u32.totalorder %s2501_s27, %s3206_s3 }
 0x206   :  { %p2507_p3 = pnand %p2505_p2, %p2502_p1 }
 0x208   :  { %2510 = shalt.err (!%p2507_p3)
}
 0x209   :  { %1466 = dma.vmem_to_hbm [thread:$0]  %s1461_s22, 128, %s3206_s3, [#allocation4], %s2521_s1, %s2521_s1, %s2522_s9  }
 0x20a   :  { %2515 = dma.done.wait [#allocation4], 128  }
 0x20b   :  { %2516 = vsyncadd [#allocation4], 4294967168 }
 0x20c   :  { %1470 = vsyncpa [#allocation3], 1 }
 0x20d   :  { %1471 = vsyncpa [#allocation6], 1 }
 0x20e   :  { %1472 = vsyncpa [#allocation4], 1 }

</bundles_post_ra>
